<compile_context>
chip_gen: v7x
topology: tpu7x:2x2x1
jax: 0.10.0
libtpu: 0.0.40
codegen_flags: <defaults>
</compile_context>

<pallas_src>
import functools

import jax
import jax.numpy as jnp
import numpy as np
from jax import lax
from jax.experimental import pallas as pl
from jax.experimental.pallas import tpu as pltpu

_EPS = 1e-19  # same epsilon as the PyTorch `dice`


def _pow2_floor(x):
    x = int(x)
    return 1 << (x.bit_length() - 1)


def _pow2_ceil(x):
    x = int(x)
    return 1 if x <= 1 else 1 << ((x - 1).bit_length())


def _lane_fold(v, width=128):
    """Binary-tree fold of the last (lane) axis down to `width` lanes.

    Pure lane-aligned slices + VPU adds (no XLU cross-lane reduce); requires
    the last dim to be `width * 2**k`.
    """
    n = v.shape[-1]
    while n > width:
        n //= 2
        v = v[..., :n] + v[..., n:]
    return v


def _dc_ce_kernel(logits_ref, tgt_ref, out_ref, *,
                  nb_classes, s_total, tile_s, ragged):
    si = pl.program_id(1)
    num_s = pl.num_programs(1)
    C = nb_classes

    # out_ref (1, 3C+1, 128) is the per-batch accumulator: rows [0,C) intersect,
    # [C,2C) softmax-prob sum, [2C,3C) one-hot sum, row 3C cross-entropy sum.
    @pl.when(si == 0)
    def _init():
        out_ref[...] = jnp.zeros_like(out_ref)

    x = logits_ref[0].astype(jnp.float32)     # (C, ts) classes on sublanes
    t = tgt_ref[0]                            # (1, ts) int32

    def accumulate(valid):
        # valid is None on full tiles (fast path); (1, ts) bool on the last,
        # ragged tile only.
        xm = jnp.where(valid, x, 0.0) if valid is not None else x

        # --- softmax over classes (sublane axis, numerically stable) ---
        m = jnp.max(xm, axis=0, keepdims=True)            # (1, ts)
        ex = jnp.exp(xm - m)                               # (C, ts)
        denom = jnp.sum(ex, axis=0, keepdims=True)         # (1, ts)
        # EUP approx reciprocal + one Newton step (~f32-exact) instead of the
        # multi-op exact divide on the saturated VALU slot.
        r = pl.reciprocal(denom, approx=True)
        r = r * (2.0 - denom * r)
        p = ex * r                                         # (C, ts)

        # --- one-hot target via iota compare; selects instead of astype*mul ---
        cls = lax.broadcasted_iota(jnp.int32, (C, xm.shape[-1]), 0)
        onehot_b = cls == t                                # (C, ts) bool
        if valid is not None:
            onehot_b = jnp.logical_and(onehot_b, valid)
            p = jnp.where(valid, p, 0.0)

        inter = jnp.where(onehot_b, p, 0.0)                # (C, ts)
        onehot_f = jnp.where(onehot_b, 1.0, 0.0)           # (C, ts)

        # --- cross entropy: logsumexp - logit[target] ---
        picked = jnp.sum(jnp.where(onehot_b, xm, 0.0), axis=0, keepdims=True)
        ce = m + jnp.log(denom) - picked                   # (1, ts)
        if valid is not None:
            ce = jnp.where(valid, ce, 0.0)

        # Lane-fold to 128 lanes (pure VPU) and accumulate into the resident
        # per-batch output block; the final cross-lane reduce happens in JAX.
        out_ref[0, 0:C, :] += _lane_fold(inter)
        out_ref[0, C:2 * C, :] += _lane_fold(p)
        out_ref[0, 2 * C:3 * C, :] += _lane_fold(onehot_f)
        out_ref[0, 3 * C:3 * C + 1, :] += _lane_fold(ce)

    # TODO(synk): if a v5e bundle dump shows vst saturation / vreg spills at
    # large tiles, process the tile in unrolled 2-4K-lane sub-chunks (pl.ds +
    # lax.fori_loop(unroll=True)) to bound live ranges.
    if ragged:
        is_last = si == num_s - 1

        @pl.when(jnp.logical_not(is_last))
        def _full_tile():
            accumulate(None)

        @pl.when(is_last)
        def _ragged_tile():
            lane = lax.broadcasted_iota(jnp.int32, (1, tile_s), 1)
            valid = (si * tile_s + lane) < s_total
            accumulate(valid)
    else:
        accumulate(None)


def dc_ce_loss(output_ncdhw, target_indices, *, max_spatial_tile=None):
    """output_ncdhw: (B, C, D, H, W) float; target_indices: (B, 1, D, H, W) int."""
    B, C, D, H, W = output_ncdhw.shape
    S = D * H * W

    # Native-order reshape only -- no transpose, no wrapper dtype cast (bf16
    # logits pass straight through and are widened in-kernel).
    logits = output_ncdhw.reshape(B, C, S)
    # TODO(synk): targets could be stored as int8/int16 in HBM and widened
    # in-kernel to cut target traffic further.
    tgt = target_indices.reshape(B, 1, S).astype(jnp.int32)

    # ---- spatial tile selection (per-generation VMEM aware) ----
    try:
        vmem_phys = int(pltpu.get_tpu_info().vmem_capacity_bytes)
    except Exception:
        vmem_phys = 64 << 20                    # v7x per-core; conservative
    vmem_budget = min(vmem_phys // 2, 48 << 20)
    # bytes per spatial lane: double-buffered logits + targets plus ~6 live
    # C-wide f32 intermediates of the softmax / one-hot / CE chain.
    per_lane_bytes = 4 * (8 * C + 6)
    ts_cap = max(128, _pow2_floor(max(vmem_budget // per_lane_bytes, 128)))
    if max_spatial_tile is not None:
        ts_cap = max(128, _pow2_floor(min(ts_cap, max_spatial_tile)))

    # Power-of-two tile (needed by the binary lane fold), no larger than the
    # volume, preferring a tile that divides S exactly (removes all masking).
    ts = min(ts_cap, _pow2_ceil(max(S, 128)))
    p2_div = S & (-S)                           # largest power-of-two divisor
    if 128 <= p2_div < ts and p2_div >= ts // 8:
        ts = p2_div
    ragged = (S % ts) != 0
    n_s = pl.cdiv(S, ts)
    rows = 3 * C + 1

    kernel = functools.partial(_dc_ce_kernel, nb_classes=C, s_total=S,
                               tile_s=ts, ragged=ragged)

    partials = pl.pallas_call(
        kernel,
        out_shape=jax.ShapeDtypeStruct((B, rows, 128), jnp.float32),
        grid_spec=pltpu.PrefetchScalarGridSpec(
            num_scalar_prefetch=0,
            grid=(B, n_s),                      # spatial/reduction axis last
            in_specs=[
                pl.BlockSpec((1, C, ts), lambda b, s: (b, 0, s)),
                pl.BlockSpec((1, 1, ts), lambda b, s: (b, 0, s)),
            ],
            # Same block across the spatial axis -> resident per-batch
            # accumulator; distinct per batch -> batch axis can go parallel.
            out_specs=pl.BlockSpec((1, rows, 128), lambda b, s: (b, 0, 0)),
        ),
        compiler_params=pltpu.CompilerParams(
            dimension_semantics=("parallel", "arbitrary"),
            vmem_limit_bytes=int(vmem_budget),
        ),
    )(logits, tgt)

    # Tiny (B, 3C+1, 128) epilogue in plain JAX.
    inter = jnp.sum(partials[:, 0:C, :], axis=-1)           # (B, C)
    psum = jnp.sum(partials[:, C:2 * C, :], axis=-1)        # (B, C)
    tsum = jnp.sum(partials[:, 2 * C:3 * C, :], axis=-1)    # (B, C)
    ce_sum = jnp.sum(partials[:, 3 * C, :])
    dice = 2.0 * inter / (psum + tsum + _EPS)
    dc_loss = 1.0 - jnp.mean(dice)
    ce_loss = ce_sum / float(B * S)
    return dc_loss + ce_loss


def _reference_loss(output, target):
    """Pure-JAX reference matching the PyTorch DC_CE forward."""
    B, C, D, H, W = output.shape
    p = jax.nn.softmax(output.astype(jnp.float32), axis=1)
    oh = jax.nn.one_hot(target[:, 0], C, axis=1, dtype=jnp.float32)
    inter = jnp.sum(p * oh, axis=(2, 3, 4))
    dice = 2.0 * inter / (jnp.sum(p, (2, 3, 4)) + jnp.sum(oh, (2, 3, 4)) + _EPS)
    dc = 1.0 - dice.mean()
    logits = jnp.transpose(output, (0, 2, 3, 4, 1)).reshape(-1, C).astype(jnp.float32)
    t = target.reshape(-1).astype(jnp.int32)
    logp = jax.nn.log_softmax(logits, axis=-1)
    ce = -jnp.mean(logp[jnp.arange(t.shape[0]), t])
    return ce + dc


if __name__ == "__main__":
    key = jax.random.PRNGKey(0)
    k1, k2, k3, k4, k5, k6 = jax.random.split(key, 6)

    # Case 1: S is a power-of-two -> single full tile, no masking anywhere.
    B, C, D, H, W = 2, 4, 4, 8, 8             # S = 256
    out1 = jax.random.normal(k1, (B, C, D, H, W), dtype=jnp.float32)
    tgt1 = jax.random.randint(k2, (B, 1, D, H, W), 0, C, dtype=jnp.int32)
    loss1 = jax.block_until_ready(dc_ce_loss(out1, tgt1))
    ref1 = jax.block_until_ready(_reference_loss(out1, tgt1))
    np.testing.assert_allclose(np.asarray(loss1), np.asarray(ref1),
                               rtol=1e-5, atol=1e-5)

    # Case 2: forces multiple tiles + a ragged (pl.when-gated masked) last tile.
    B, C, D, H, W = 2, 4, 4, 8, 10            # S = 320, tile = 128 -> 3 tiles
    out2 = jax.random.normal(k3, (B, C, D, H, W), dtype=jnp.float32)
    tgt2 = jax.random.randint(k4, (B, 1, D, H, W), 0, C, dtype=jnp.int32)
    loss2 = jax.block_until_ready(dc_ce_loss(out2, tgt2, max_spatial_tile=128))
    ref2 = jax.block_until_ready(_reference_loss(out2, tgt2))
    np.testing.assert_allclose(np.asarray(loss2), np.asarray(ref2),
                               rtol=1e-5, atol=1e-5)

    # Case 3: multiple full tiles, no ragged tile (exact-divide tile path).
    B, C, D, H, W = 2, 4, 4, 8, 16            # S = 512, tile = 256 -> 2 tiles
    out3 = jax.random.normal(k5, (B, C, D, H, W), dtype=jnp.float32)
    tgt3 = jax.random.randint(k6, (B, 1, D, H, W), 0, C, dtype=jnp.int32)
    loss3 = jax.block_until_ready(dc_ce_loss(out3, tgt3, max_spatial_tile=256))
    ref3 = jax.block_until_ready(_reference_loss(out3, tgt3))
    np.testing.assert_allclose(np.asarray(loss3), np.asarray(ref3),
                               rtol=1e-5, atol=1e-5)

    print("KERNEL_OK")
</pallas_src>

<mosaic_0001>
module attributes {stable_mosaic.version = 11 : i64} {
  func.func @_dc_ce_kernel(%arg0: i32, %arg1: i32, %arg2: memref<1x4x256xf32, #tpu.memory_space<vmem>>, %arg3: memref<1x1x256xi32, #tpu.memory_space<vmem>>, %arg4: memref<1x13x128xf32, #tpu.memory_space<vmem>>) attributes {dimension_semantics = [#tpu.dimension_semantics<parallel>, #tpu.dimension_semantics<arbitrary>], iteration_bounds = array<i64: 2, 1>, scalar_prefetch = 0 : i64, scratch_operands = 0 : i64, tpu.core_type = #tpu.core_type<tc>, window_params = [{transform_indices = @transform_0, window_bounds = array<i64: 1, 4, 256>}, {transform_indices = @transform_1, window_bounds = array<i64: 1, 1, 256>}, {transform_indices = @transform_2, window_bounds = array<i64: 1, 13, 128>}]} {
    %c0_i32 = arith.constant 0 : i32
    %0 = arith.cmpi eq, %arg1, %c0_i32 : i32
    %1 = arith.extui %0 : i1 to i32
    %c0_i32_0 = arith.constant 0 : i32
    %2 = arith.cmpi ne, %1, %c0_i32_0 : i32
    scf.if %2 {
      %cst_34 = arith.constant 0.000000e+00 : f32
      %72 = vector.broadcast %cst_34 : f32 to vector<1x13x128xf32>
      %c0_35 = arith.constant 0 : index
      %c0_36 = arith.constant 0 : index
      %c0_37 = arith.constant 0 : index
      %73 = vector.load %arg4[%c0_35, %c0_36, %c0_37] : memref<1x13x128xf32, #tpu.memory_space<vmem>>, vector<1x13x128xf32>
      tpu.vector_store %arg4[%c0_35, %c0_36, %c0_37], %72 {strides = array<i32>} : memref<1x13x128xf32, #tpu.memory_space<vmem>>, vector<1x13x128xf32>,
    } else {
    }
    %c0 = arith.constant 0 : index
    %c0_1 = arith.constant 0 : index
    %c0_2 = arith.constant 0 : index
    %3 = vector.load %arg2[%c0, %c0_1, %c0_2] : memref<1x4x256xf32, #tpu.memory_space<vmem>>, vector<1x4x256xf32>
    %4 = vector.shape_cast %3 : vector<1x4x256xf32> to vector<4x256xf32>
    %c0_3 = arith.constant 0 : index
    %c0_4 = arith.constant 0 : index
    %c0_5 = arith.constant 0 : index
    %5 = vector.load %arg3[%c0_3, %c0_4, %c0_5] : memref<1x1x256xi32, #tpu.memory_space<vmem>>, vector<1x1x256xi32>
    %6 = vector.shape_cast %5 : vector<1x1x256xi32> to vector<1x256xi32>
    %cst = arith.constant dense<0xFF800000> : vector<256xf32>
    %7 = vector.multi_reduction <maximumf>, %4, %cst [0] : vector<4x256xf32> to vector<256xf32>
    %8 = vector.shape_cast %7 : vector<256xf32> to vector<1x256xf32>
    %9 = vector.broadcast %8 : vector<1x256xf32> to vector<4x256xf32>
    %10 = arith.subf %4, %9 : vector<4x256xf32>
    %11 = math.exp %10 : vector<4x256xf32>
    %cst_6 = arith.constant dense<0.000000e+00> : vector<256xf32>
    %12 = vector.multi_reduction <add>, %11, %cst_6 [0] : vector<4x256xf32> to vector<256xf32>
    %13 = vector.shape_cast %12 : vector<256xf32> to vector<1x256xf32>
    %14 = tpu.reciprocal %13 {approx = true} : vector<1x256xf32> -> vector<1x256xf32>
    %15 = arith.mulf %13, %14 : vector<1x256xf32>
    %cst_7 = arith.constant 2.000000e+00 : f32
    %16 = vector.broadcast %cst_7 : f32 to vector<1x256xf32>
    %17 = arith.subf %16, %15 : vector<1x256xf32>
    %18 = arith.mulf %14, %17 : vector<1x256xf32>
    %19 = vector.broadcast %18 : vector<1x256xf32> to vector<4x256xf32>
    %20 = arith.mulf %11, %19 : vector<4x256xf32>
    %21 = tpu.iota {dimensions = array<i32: 0>} : vector<4x256xi32>
    %22 = vector.broadcast %6 : vector<1x256xi32> to vector<4x256xi32>
    %23 = arith.cmpi eq, %21, %22 : vector<4x256xi32>
    %cst_8 = arith.constant 0.000000e+00 : f32
    %24 = vector.broadcast %cst_8 : f32 to vector<4x256xf32>
    %25 = arith.select %23, %20, %24 : vector<4x256xi1>, vector<4x256xf32>
    %cst_9 = arith.constant 1.000000e+00 : f32
    %cst_10 = arith.constant 0.000000e+00 : f32
    %26 = vector.broadcast %cst_9 : f32 to vector<4x256xf32>
    %27 = vector.broadcast %cst_10 : f32 to vector<4x256xf32>
    %28 = arith.select %23, %26, %27 : vector<4x256xi1>, vector<4x256xf32>
    %cst_11 = arith.constant 0.000000e+00 : f32
    %29 = vector.broadcast %cst_11 : f32 to vector<4x256xf32>
    %30 = arith.select %23, %4, %29 : vector<4x256xi1>, vector<4x256xf32>
    %cst_12 = arith.constant dense<0.000000e+00> : vector<256xf32>
    %31 = vector.multi_reduction <add>, %30, %cst_12 [0] : vector<4x256xf32> to vector<256xf32>
    %32 = vector.shape_cast %31 : vector<256xf32> to vector<1x256xf32>
    %33 = math.log %13 : vector<1x256xf32>
    %34 = arith.addf %8, %33 : vector<1x256xf32>
    %35 = arith.subf %34, %32 : vector<1x256xf32>
    %c0_13 = arith.constant 0 : index
    %c0_14 = arith.constant 0 : index
    %c0_15 = arith.constant 0 : index
    %36 = vector.load %arg4[%c0_13, %c0_14, %c0_15] : memref<1x13x128xf32, #tpu.memory_space<vmem>>, vector<1x4x128xf32>
    %37 = vector.shape_cast %36 : vector<1x4x128xf32> to vector<4x128xf32>
    %38 = vector.extract_strided_slice %25 {offsets = [0, 0], sizes = [4, 128], strides = [1, 1]} : vector<4x256xf32> to vector<4x128xf32>
    %39 = vector.extract_strided_slice %25 {offsets = [0, 128], sizes = [4, 128], strides = [1, 1]} : vector<4x256xf32> to vector<4x128xf32>
    %40 = arith.addf %38, %39 : vector<4x128xf32>
    %41 = arith.addf %37, %40 : vector<4x128xf32>
    %c0_16 = arith.constant 0 : index
    %c0_17 = arith.constant 0 : index
    %c0_18 = arith.constant 0 : index
    %42 = vector.load %arg4[%c0_16, %c0_17, %c0_18] : memref<1x13x128xf32, #tpu.memory_space<vmem>>, vector<1x4x128xf32>
    %43 = vector.shape_cast %42 : vector<1x4x128xf32> to vector<4x128xf32>
    %44 = vector.shape_cast %41 : vector<4x128xf32> to vector<1x4x128xf32>
    tpu.vector_store %arg4[%c0_16, %c0_17, %c0_18], %44 {strides = array<i32>} : memref<1x13x128xf32, #tpu.memory_space<vmem>>, vector<1x4x128xf32>,
    %c0_19 = arith.constant 0 : index
    %c4 = arith.constant 4 : index
    %c0_20 = arith.constant 0 : index
    %45 = vector.load %arg4[%c0_19, %c4, %c0_20] : memref<1x13x128xf32, #tpu.memory_space<vmem>>, vector<1x4x128xf32>
    %46 = vector.shape_cast %45 : vector<1x4x128xf32> to vector<4x128xf32>
    %47 = vector.extract_strided_slice %20 {offsets = [0, 0], sizes = [4, 128], strides = [1, 1]} : vector<4x256xf32> to vector<4x128xf32>
    %48 = vector.extract_strided_slice %20 {offsets = [0, 128], sizes = [4, 128], strides = [1, 1]} : vector<4x256xf32> to vector<4x128xf32>
    %49 = arith.addf %47, %48 : vector<4x128xf32>
    %50 = arith.addf %46, %49 : vector<4x128xf32>
    %c0_21 = arith.constant 0 : index
    %c4_22 = arith.constant 4 : index
    %c0_23 = arith.constant 0 : index
    %51 = vector.load %arg4[%c0_21, %c4_22, %c0_23] : memref<1x13x128xf32, #tpu.memory_space<vmem>>, vector<1x4x128xf32>
    %52 = vector.shape_cast %51 : vector<1x4x128xf32> to vector<4x128xf32>
    %53 = vector.shape_cast %50 : vector<4x128xf32> to vector<1x4x128xf32>
    tpu.vector_store %arg4[%c0_21, %c4_22, %c0_23], %53 {strides = array<i32>} : memref<1x13x128xf32, #tpu.memory_space<vmem>>, vector<1x4x128xf32>,
    %c0_24 = arith.constant 0 : index
    %c8 = arith.constant 8 : index
    %c0_25 = arith.constant 0 : index
    %54 = vector.load %arg4[%c0_24, %c8, %c0_25] : memref<1x13x128xf32, #tpu.memory_space<vmem>>, vector<1x4x128xf32>
    %55 = vector.shape_cast %54 : vector<1x4x128xf32> to vector<4x128xf32>
    %56 = vector.extract_strided_slice %28 {offsets = [0, 0], sizes = [4, 128], strides = [1, 1]} : vector<4x256xf32> to vector<4x128xf32>
    %57 = vector.extract_strided_slice %28 {offsets = [0, 128], sizes = [4, 128], strides = [1, 1]} : vector<4x256xf32> to vector<4x128xf32>
    %58 = arith.addf %56, %57 : vector<4x128xf32>
    %59 = arith.addf %55, %58 : vector<4x128xf32>
    %c0_26 = arith.constant 0 : index
    %c8_27 = arith.constant 8 : index
    %c0_28 = arith.constant 0 : index
    %60 = vector.load %arg4[%c0_26, %c8_27, %c0_28] : memref<1x13x128xf32, #tpu.memory_space<vmem>>, vector<1x4x128xf32>
    %61 = vector.shape_cast %60 : vector<1x4x128xf32> to vector<4x128xf32>
    %62 = vector.shape_cast %59 : vector<4x128xf32> to vector<1x4x128xf32>
    tpu.vector_store %arg4[%c0_26, %c8_27, %c0_28], %62 {strides = array<i32>} : memref<1x13x128xf32, #tpu.memory_space<vmem>>, vector<1x4x128xf32>,
    %c0_29 = arith.constant 0 : index
    %c12 = arith.constant 12 : index
    %c0_30 = arith.constant 0 : index
    %63 = vector.load %arg4[%c0_29, %c12, %c0_30] : memref<1x13x128xf32, #tpu.memory_space<vmem>>, vector<1x1x128xf32>
    %64 = vector.shape_cast %63 : vector<1x1x128xf32> to vector<1x128xf32>
    %65 = vector.extract_strided_slice %35 {offsets = [0, 0], sizes = [1, 128], strides = [1, 1]} : vector<1x256xf32> to vector<1x128xf32>
    %66 = vector.extract_strided_slice %35 {offsets = [0, 128], sizes = [1, 128], strides = [1, 1]} : vector<1x256xf32> to vector<1x128xf32>
    %67 = arith.addf %65, %66 : vector<1x128xf32>
    %68 = arith.addf %64, %67 : vector<1x128xf32>
    %c0_31 = arith.constant 0 : index
    %c12_32 = arith.constant 12 : index
    %c0_33 = arith.constant 0 : index
    %69 = vector.load %arg4[%c0_31, %c12_32, %c0_33] : memref<1x13x128xf32, #tpu.memory_space<vmem>>, vector<1x1x128xf32>
    %70 = vector.shape_cast %69 : vector<1x1x128xf32> to vector<1x128xf32>
    %71 = vector.shape_cast %68 : vector<1x128xf32> to vector<1x1x128xf32>
    tpu.vector_store %arg4[%c0_31, %c12_32, %c0_33], %71 {strides = array<i32>} : memref<1x13x128xf32, #tpu.memory_space<vmem>>, vector<1x1x128xf32>,
    return
  }
  func.func @transform_0(%arg0: i32, %arg1: i32) -> (i32, i32, i32) {
    %c0_i32 = arith.constant 0 : i32
    %c0_i32_0 = arith.constant 0 : i32
    return %arg0, %c0_i32, %arg1 : i32, i32, i32
  }
  func.func @transform_1(%arg0: i32, %arg1: i32) -> (i32, i32, i32) {
    %c0_i32 = arith.constant 0 : i32
    %c0_i32_0 = arith.constant 0 : i32
    return %arg0, %c0_i32, %arg1 : i32, i32, i32
  }
  func.func @transform_2(%arg0: i32, %arg1: i32) -> (i32, i32, i32) {
    %c0_i32 = arith.constant 0 : i32
    %c0_i32_0 = arith.constant 0 : i32
    %c0_i32_1 = arith.constant 0 : i32
    return %arg0, %c0_i32, %c0_i32_0 : i32, i32, i32
  }
}

</mosaic_0001>

<bundles_post_ra>
// kernel: tpu_custom_call.1
= control target key start
LH: loop header
LB: loop body
LE: loop exit
PB: predicated region body
PF: predicated region fallthrough
CT: control target
= control target key end

     0   :  { %7 = vsyncpa [#allocation3], 0  ;;  %s890_s0 = inlined_call_operand.hbm [shape: f32[2,4,256], index: 0, kind: input, shape index: {}]   ;;  %s891_s1 = inlined_call_operand.hbm [shape: s32[2,1,256], index: 1, kind: input, shape index: {}]   ;;  %s892_s2 = inlined_call_operand.vmem [shape: f32[2,13,128], index: 2, kind: output, shape index: {}]  }
   0x1   :  { %9 = vsyncpa [#allocation3 + $0x1], 0 }
   0x2   :  { %10 = vsyncpa [#allocation5], 0 }
   0x3   :  { %12 = vsyncpa [#allocation5 + $0x1], 0  ;;  %s676_s9 = smov 0   ;;  %s678_s10 = smov 0  }
   0x4   :  { %s680_s11 = smov 0   ;;  %s682_s12 = smov 0  }
   0x5   :  { %s684_s13 = smov 0   ;;  %s686_s14 = smov 0  }
   0x6 LB: > { %s450_s15 = sadd.s32 4294967295, %s656_s14   ;;  %s30_s16 = sadd.s32 1, %s652_s13  ;;  %s656_s14 = sphi %s686_s14, %s18_s14   ;;  %s652_s13 = sphi %s684_s13, %s906_s13   ;;  %s648_s12 = sphi %s682_s12, %s905_s12   ;;  %s644_s11 = sphi %s680_s11, %s904_s11   ;;  %s640_s10 = sphi %s678_s10, %s903_s10   ;;  %s636_s9 = sphi %s676_s9, %s902_s9  }
   0x7   : > { %p32_p0 = scmp.ge.s32.totalorder %s30_s16, 2  ;;  %s39_s17 = sadd.s32 1, %s644_s11 }
   0x8   : > { %p46_p1 = scmp.ne.s32.totalorder %s644_s11, %s640_s10  ;;  %p47_p2 = scmp.eq.s32.totalorder %s656_s14, 0 }
   0x9   : > { %s908_s16 = smov (%p32_p0, %s30_s16), 0  ;;  %p52_p4 = scmp.ne.s32.totalorder %s640_s10, %s636_s9 }
   0xa   : > { %p712_p3 = por %p47_p2, %p46_p1  ;;  %s34_s19 = ssub.s32 %s652_s13, %s908_s16 }
   0xb   : > { %p53_p5 = scmp.eq.s32.totalorder %s450_s15, 0  ;;  %p37_p6 = scmp.eq.s32.totalorder %s34_s19, 0 }
   0xc   : > { %p481_p8 = scmp.lt.s32.totalorder %s656_s14, 2  ;;  %s728_s22 = sand.u32 1, %s644_s11  }
   0xd   : > { %p719_p7 = por %p53_p5, %p52_p4  ;;  %s467_s23 = sshll.u32 %s652_s13, 7 }
   0xe   : > { %s725_s21 = scalar_select %p37_p6, %s644_s11, %s39_s17  }
   0xf   : > { %s895_s20 = scalar_select %p719_p7, 1, 0 }
  0x10   : > { %s454_s24 = sshll.u32 %s728_s22, 3  ;;  %s735_s27 = scalar_lea.hbm %s890_s0, %s467_s23 }
  0x11   : > { %s134_s28 = scalar_lea.vmem [#allocation2], %s454_s24  ;;  %p739_p9 = pnand %p481_p8, %p712_p3 }
  0x12   : > { %s144_s29 = sshll.u32 %s134_s28, 4  ;;  %s131_s3 = scalar_lea.sflag [#allocation3], %s728_s22  ;;  %s743_s29 = int_to_ptr.vmem [resolvable:$true] %s144_s29 }
  0x13   : > { %s542_s4 = scalar_lea.hbm %s735_s27, 128  ;;  %p544_p13 = pneg %p739_p9 }
  0x14   : > { %p543_p12 = scmp.ne.s32.totalorder %s735_s27, %s542_s4  ;;  %s547_s7 = scalar_lea.hbm %s890_s0, 256 }
  0x15   : > { %p548_p2 = scmp.lt.u32.totalorder %s735_s27, %s890_s0  ;;  %p549_p3 = scmp.lt.u32.totalorder %s547_s7, %s542_s4 }
  0x16   : > { %p545_p0 = pnand %p544_p13, %p543_p12  ;;  %p551_p5 = scmp.lt.u32.totalorder %s542_s4, %s735_s27 }
  0x17   : > { %p550_p4 = por %p549_p3, %p548_p2 }
  0x18   : > { %p546_p1 = pneg %p545_p0 }
  0x19   : > { %p552_p6 = por %p551_p5, %p550_p4 }
  0x1b   : > { %p553_p8 = pnand %p552_p6, %p546_p1 }
  0x1d   : > { %556 = shalt.err (!%p553_p8)
}
  0x1e   : > { %s557_s15 = scalar_lea.vmem %s743_s29, 128  ;;  %s658_s17 = smov [#allocation2]  }
  0x1f   : > { %p558_p12 = scmp.ne.s32.totalorder %s743_s29, %s557_s15  ;;  %s562_s18 = sshll.u32 %s658_s17, 4  ;;  %s563_s18 = int_to_ptr.vmem [resolvable:$false] %s562_s18 }
  0x20   : > { %s564_s19 = scalar_lea.vmem %s563_s18, 256  ;;  %p565_p11 = scmp.lt.s32.totalorder %s743_s29, %s563_s18 }
  0x21   : > { %p560_p0 = pnand %p558_p12, %p544_p13  ;;  %p566_p2 = scmp.lt.s32.totalorder %s564_s19, %s557_s15 }
  0x23   : > { %p561_p10 = pneg %p560_p0  ;;  %p567_p3 = por %p566_p2, %p565_p11 }
  0x25   : > { %p568_p4 = pnand %p567_p3, %p561_p10 }
  0x27   : > { %571 = shalt.err (!%p568_p4)
}
  0x28   : > { %477 = dma.hbm_to_vmem [thread:$0]  (!%p739_p9), %s735_s27, 128, %s743_s29, %s131_s3  }
  0x29   : > { %p897_p1 = scmp.lt.s32.totalorder %s656_s14, 3  ;;  %p898_p5 = scmp.ge.s32.totalorder %s656_s14, 1 }
  0x2a   : > { %s457_s24 = sshll.u32 %s728_s22, 1  ;;  %s468_s25 = sshll.u32 %s652_s13, 5 }
  0x2b   : > { %p777_p6 = pnand %p898_p5, %p897_p1  ;;  %s786_s4 = scalar_lea.hbm %s891_s1, %s468_s25 }
  0x2c   : > { %s155_s5 = scalar_lea.vmem [#allocation4], %s457_s24  ;;  %s152_s27 = scalar_lea.sflag [#allocation5], %s728_s22 }
  0x2d   : > { %s899_s23 = scalar_select %p777_p6, 1, 0 }
  0x2e   : > { %s165_s6 = sshll.u32 %s155_s5, 4  ;;  %s572_s29 = scalar_lea.hbm %s786_s4, 32  ;;  %s166_s6 = int_to_ptr.vmem [resolvable:$true] %s165_s6 }
  0x2f   : > { %p573_p10 = scmp.ne.s32.totalorder %s786_s4, %s572_s29  ;;  %s577_s8 = scalar_lea.hbm %s891_s1, 64 }
  0x30   : > { %p578_p12 = scmp.lt.u32.totalorder %s786_s4, %s891_s1  ;;  %p579_p0 = scmp.lt.u32.totalorder %s577_s8, %s572_s29 }
  0x31   : > { %p575_p11 = pnand %p573_p10, %p544_p13  ;;  %p581_p3 = scmp.lt.u32.totalorder %s572_s29, %s786_s4 }
  0x32   : > { %p580_p2 = por %p579_p0, %p578_p12 }
  0x33   : > { %p576_p8 = pneg %p575_p11 }
  0x34   : > { %p582_p4 = por %p581_p3, %p580_p2 }
  0x36   : > { %p583_p1 = pnand %p582_p4, %p576_p8 }
  0x38   : > { %586 = shalt.err (!%p583_p1)
}
  0x39   : > { %s587_s22 = scalar_lea.vmem %s166_s6, 32  ;;  %s659_s17 = smov [#allocation4]  }
  0x3a   : > { %p588_p5 = scmp.ne.s32.totalorder %s166_s6, %s587_s22  ;;  %s592_s18 = sshll.u32 %s659_s17, 4  ;;  %s593_s18 = int_to_ptr.vmem [resolvable:$false] %s592_s18 }
  0x3b   : > { %s594_s19 = scalar_lea.vmem %s593_s18, 64  ;;  %p595_p7 = scmp.lt.s32.totalorder %s166_s6, %s593_s18 }
  0x3c   : > { %p590_p10 = pnand %p588_p5, %p544_p13  ;;  %p596_p6 = scmp.lt.s32.totalorder %s594_s19, %s587_s22 }
  0x3e   : > { %p591_p11 = pneg %p590_p10  ;;  %p597_p0 = por %p596_p6, %p595_p7 }
  0x40   : > { %p598_p12 = pnand %p597_p0, %p591_p11 }
  0x42   : > { %601 = shalt.err (!%p598_p12)
}
  0x43   : > { %480 = dma.hbm_to_vmem [thread:$0]  (!%p739_p9), %s786_s4, 32, %s166_s6, %s152_s27  }
  0x44   : > { %p900_p8 = scmp.ne.s32.totalorder %s899_s23, 0 }
  0x45   : > { %s176_s24 = sand.u32 (!%p900_p8), 1, %s640_s10   ;;  %p901_p13 = scmp.ne.s32.totalorder (!%p900_p8), %s895_s20, 0 }
  0x46   : > { %174 = sbr.rel (%p900_p8) target bundleno = 158 (0x9e), region = 28  ;;  %s461_s25 = sshll.u32 (!%p900_p8), %s176_s24, 3 }
  0x47   : > { %s177_s26 = scalar_lea.sflag (!%p900_p8), [#allocation3], %s176_s24  ;;  %s180_s28 = scalar_lea.vmem (!%p900_p8), [#allocation2], %s461_s25 }
  0x4d   : > { %627 = dma.done.wait (%p901_p13), %s177_s26, 128  }
  0x4e   : > { %629 = vsyncadd (%p901_p13), %s177_s26, 4294967168  ;;  %s462_s5 = sshll.u32 %s176_s24, 1  ;;  %s186_s29 = scalar_lea.sflag [#allocation5], %s176_s24 }
  0x4f   : > { %s189_s30 = scalar_lea.vmem [#allocation4], %s462_s5 }
  0x50   : > { %631 = dma.done.wait (%p901_p13), %s186_s29, 32  }
  0x51   : > { %633 = vsyncadd (%p901_p13), %s186_s29, 4294967264  ;;  %p217_p7 = scmp.lt.s32.totalorder %s648_s12, 1  ;;  %v285_v0 = vlaneseq  ;;  %vm233_vm0 = vcmask 1043456   ;;  %v660_v4 = vmov 0.0   ;;  %v228_v5 = vld [vmem:[%s180_s28] sm:$0xff] }
  0x52   : > { %v229_v6 = vld [vmem:[%s189_s30] sm:$0x3]  ;;  %v231_v7 = vcombine.high %v228_v5, %v228_v5  ;;  %v234_v8 = vsel %vm233_vm0, %v228_v5, -inf }
  0x53   : > { %s910_s12 = smov (!%p217_p7, %s648_s12), 1  ;;  %v821_v1 = vshrl.u32 %v285_v0, 7  ;;  %v235_v11 = vrot.slane %v234_v8, 4 }
  0x54   : > { %s469_s23 = sshll.u32 %s910_s12, 4  ;;  %v241_v12 = vsel %vm233_vm0, %v231_v7, -inf }
  0x55   : > { %v289_v2 = vsub.s32 0, %v821_v1  ;;  %v293_v3 = vsub.s32 1, %v821_v1  ;;  %s828_s27 = scalar_lea.vmem %s892_s2, %s469_s23  ;;  %v236_v13 = vmax.f32 %v234_v8, %v235_v11  ;;  %v242_v14 = vrot.slane %v241_v12, 4 }
  0x56   : > { %226 = vst [vmem:[%s828_s27] sm:$0xff] %v660_v4  ;;  %227 = vst [vmem:[%s828_s27 + $0x8] sm:$0x1f] %v660_v4 }
  0x57   : > { %v833_v9 = vrot.slane %v229_v6, %v289_v2  ;;  %v835_v10 = vrot.slane %v229_v6, %v293_v3  ;;  %v237_v18 = vrot.slane %v236_v13, 2  ;;  %v243_v19 = vmax.f32 %v241_v12, %v242_v14 }
  0x59   : > { %vm295_vm1 = vcmp.eq.s32.totalorder %v821_v1, %v833_v9  ;;  %vm296_vm2 = vcmp.eq.s32.totalorder %v821_v1, %v835_v10  ;;  %v238_v21 = vmax.f32 %v236_v13, %v237_v18  ;;  %v244_v22 = vrot.slane %v243_v19, 2 }
  0x5a   : > { %v302_v15 = vsel %vm295_vm1, 1.0, %v660_v4  ;;  %v303_v16 = vsel %vm296_vm2, 1.0, %v660_v4  ;;  %v304_v33 = vsel %vm295_vm1, %v228_v5, 0.0  ;;  %v305_v37 = vsel %vm296_vm2, %v231_v7, 0.0 }
  0x5b   : > { %v339_v17 = vadd.f32 %v303_v16, %v302_v15  ;;  %v239_v24 = vrot.slane %v238_v21, 1  ;;  %v245_v25 = vmax.f32 %v243_v19, %v244_v22  ;;  %v306_v39 = vsel %vm233_vm0, %v304_v33, 0.0 }
  0x5c   : > { %v313_v42 = vsel %vm233_vm0, %v305_v37, 0.0  ;;  %v307_v44 = vrot.slane %v306_v39, 4 }
  0x5d   : > { %v338_v20 = vld [vmem:[%s828_s27 + $0x8] sm:$0xf]  ;;  %v240_v26 = vmax.f32 %v238_v21, %v239_v24  ;;  %v246_v27 = vrot.slane %v245_v25, 1  ;;  %v314_v46 = vrot.slane %v313_v42, 4 }
  0x5e   : > { %v340_v23 = vadd.f32 %v339_v17, %v338_v20  ;;  %v308_v49 = vadd.f32 %v307_v44, %v306_v39  ;;  %v342_v20 = vld [vmem:[%s828_s27 + $0xc] sm:$0x1] }
  0x5f   : > { %v247_v28 = vmax.f32 %v245_v25, %v246_v27  ;;  %v315_v52 = vadd.f32 %v314_v46, %v313_v42  ;;  %v332_v27 = vld [vmem:[%s828_s27 + $0x4] sm:$0xf] }
  0x60   : > { %341 = vst [vmem:[%s828_s27 + $0x8] sm:$0xf] %v340_v23  ;;  %v309_v55 = vrot.slane %v308_v49, 2 }
  0x61   : > { %v250_v29 = vcombine.low %v240_v26, %v247_v28  ;;  %v316_v57 = vrot.slane %v315_v52, 2 }
  0x62   : > { %v310_v58 = vadd.f32 %v309_v55, %v308_v49 }
  0x63   : > { %v252_v30 = vsub.f32 %v228_v5, %v250_v29  ;;  %v317_v59 = vadd.f32 %v316_v57, %v315_v52  ;;  %v328_v29 = vld [vmem:[%s828_s27] sm:$0xf] }
  0x64   : > { %v311_v60 = vrot.slane %v310_v58, 1 }
  0x65   : > { %v253_v31 = vmul.f32 1.442695, %v252_v30  ;;  %v318_v62 = vrot.slane %v317_v59, 1 }
  0x66   : > { %v312_v3 = vadd.f32 %v311_v60, %v310_v58 }
  0x67   : > { %532 = vpow2.f32 %v253_v31  ;;  %v319_v8 = vadd.f32 %v318_v62, %v317_v59 }
  0x71   : > { %v533_v32 = vpop.eup %532 }
  0x72   : > { %v256_v34 = vcombine.high %v533_v32, %v533_v32  ;;  %v258_v35 = vsel %vm233_vm0, %v533_v32, 0.0 }
  0x73   : > { %v259_v36 = vrot.slane %v258_v35, 4 }
  0x74   : > { %v265_v38 = vsel %vm233_vm0, %v256_v34, 0.0 }
  0x75   : > { %v260_v40 = vadd.f32 %v259_v36, %v258_v35  ;;  %v266_v41 = vrot.slane %v265_v38, 4 }
  0x77   : > { %v267_v43 = vadd.f32 %v266_v41, %v265_v38  ;;  %v261_v45 = vrot.slane %v260_v40, 2 }
  0x79   : > { %v262_v47 = vadd.f32 %v261_v45, %v260_v40  ;;  %v268_v48 = vrot.slane %v267_v43, 2 }
  0x7b   : > { %v263_v50 = vrot.slane %v262_v47, 1  ;;  %v269_v51 = vadd.f32 %v268_v48, %v267_v43 }
  0x7d   : > { %v264_v53 = vadd.f32 %v263_v50, %v262_v47  ;;  %v270_v54 = vrot.slane %v269_v51, 1 }
  0x7f   : > { %v271_v56 = vadd.f32 %v270_v54, %v269_v51  ;;  %534 = vrcp.f32 %v264_v53 }
  0x80   : > { %536 = vlog2.f32 %v264_v53 }
  0x81   : > { %538 = vrcp.f32 %v271_v56 }
  0x82   : > { %540 = vlog2.f32 %v271_v56 }
  0x89   : > { %v535_v61 = vpop.eup %534 }
  0x8a   : > { %v537_v63 = vpop.eup %536  ;;  %v274_v0 = vmul.f32 %v535_v61, %v264_v53 }
  0x8b   : > { %v539_v2 = vpop.eup %538  ;;  %v321_v4 = vmul.f32 0.6931472, %v537_v63 }
  0x8c   : > { %v541_v5 = vpop.eup %540  ;;  %v275_v6 = vmul.f32 %v539_v2, %v271_v56  ;;  %v276_v7 = vsub.f32 2.0, %v274_v0 }
  0x8d   : > { %v323_v11 = vmul.f32 0.6931472, %v541_v5  ;;  %v324_v12 = vadd.f32 %v321_v4, %v240_v26 }
  0x8e   : > { %v277_v13 = vsub.f32 2.0, %v275_v6  ;;  %v278_v14 = vmul.f32 %v535_v61, %v276_v7 }
  0x8f   : > { %v325_v15 = vadd.f32 %v323_v11, %v247_v28  ;;  %v326_v16 = vsub.f32 %v324_v12, %v312_v3 }
  0x90   : > { %v279_v17 = vmul.f32 %v539_v2, %v277_v13 }
  0x91   : > { %v327_v18 = vsub.f32 %v325_v15, %v319_v8 }
  0x92   : > { %v282_v19 = vcombine.low %v278_v14, %v279_v17 }
  0x93   : > { %v343_v21 = vadd.f32 %v327_v18, %v326_v16 }
  0x94   : > { %v284_v22 = vmul.f32 %v533_v32, %v282_v19 }
  0x95   : > { %v344_v23 = vadd.f32 %v343_v21, %v342_v20 }
  0x96   : > { %v298_v24 = vcombine.high %v284_v22, %v284_v22  ;;  %v300_v25 = vsel %vm295_vm1, %v284_v22, 0.0  ;;  %v333_v26 = vrot.slane %v284_v22, 4 }
  0x97   : > { %345 = vst [vmem:[%s828_s27 + $0xc] sm:$0x1] %v344_v23 }
  0x98   : > { %v301_v28 = vsel %vm296_vm2, %v298_v24, 0.0  ;;  %v335_v30 = vadd.f32 %v333_v26, %v284_v22 }
  0x99   : > { %v329_v31 = vadd.f32 %v301_v28, %v300_v25 }
  0x9a   : > { %v336_v33 = vadd.f32 %v335_v30, %v332_v27 }
  0x9b   : > { %v330_v34 = vadd.f32 %v329_v31, %v328_v29 }
  0x9c   : > { %337 = vst [vmem:[%s828_s27 + $0x4] sm:$0xf] %v336_v33 }
  0x9d   : > { %331 = vst [vmem:[%s828_s27] sm:$0xf] %v330_v34 }
  0x9e PF: > { %s18_s14 = sadd.s32 1, %s656_s14   ;;  %s902_s9 = smov %s640_s10 }
  0x9f   : > { %p15_p9 = scmp.ge.s32.totalorder %s18_s14, 4   ;;  %s903_s10 = smov %s644_s11 }
  0xa0   : > { %s904_s11 = smov %s725_s21  ;;  %s905_s12 = smov %s652_s13 }
  0xa1   : > { %s906_s13 = smov %s908_s16  ;;  %17 = sbr.rel (!%p15_p9) target bundleno = 6 (0x6), region = 85 }
  0xa8   :  { %367 = vsyncpa [#allocation3], 1 }
  0xa9   :  { %369 = vsyncpa [#allocation3 + $0x1], 1 }
  0xaa   :  { %370 = vsyncpa [#allocation5], 1 }
  0xab   :  { %372 = vsyncpa [#allocation5 + $0x1], 1 }

</bundles_post_ra>
